<compile_context>
chip_gen: v7x
topology: tpu7x:2x2x1
jax: 0.10.0
libtpu: 0.0.40
codegen_flags: <defaults>
</compile_context>

<pallas_src>
import functools

import jax
import jax.numpy as jnp
from jax import lax
from jax.experimental import pallas as pl
from jax.experimental.pallas import tpu as pltpu

# ---- module hyper-parameters (mirrors GumbelVectorQuantizer.__init__) ----
DIM = 32                  # input channel dim
NUM_VARS = 8              # V: codebook entries per group
GROUPS = 2                # G
VQ_DIM = 32               # output quantized dim
VAR_DIM = VQ_DIM // GROUPS
COMBINE_GROUPS = False    # codebook has GROUPS * NUM_VARS rows
TIME_FIRST = True
TEMP = (2.0, 0.5, 0.999)  # (max_temp, min_temp, decay); curr_temp = max_temp


def _round_up(a, m):
    return (a + m - 1) // m * m


def gvq_kernel(x_ref, w_ref, b_ref, bd_ref, q_ref, oh_ref, stats_ref, *, valid_rows):
    """One grid step processes a (TM, DIM) tile of the flattened (B*T, DIM) input.

    Outputs per tile:
      q_ref     : (TM, VQ_DIM)  quantized vectors
      oh_ref    : (TM, G*V)     hard one-hot (subword_prob)
      stats_ref : (8, G*V)      row 0 = sum of one-hots, row 1 = sum of softmax probs
                                (padded rows masked out), rows 2..7 zero.
    No cross-grid-step state -> grid axis can be "parallel".
    """
    TM = x_ref.shape[0]
    G, V = GROUPS, NUM_VARS
    GV = G * V

    x = x_ref[...].astype(jnp.float32)                            # (TM, DIM)
    # weight_proj: logits = x @ W + b                             # (TM, G*V)
    logits = jnp.dot(x, w_ref[...], preferred_element_type=jnp.float32) + b_ref[...]

    # validity mask for padded rows (B*T rounded up to a multiple of the tile)
    row = pl.program_id(0) * TM + lax.broadcasted_iota(jnp.int32, (TM, 1), 0)
    valid = (row < valid_rows).astype(jnp.float32)                # (TM, 1)

    oh_parts, sm_parts = [], []
    for g in range(G):  # G is small & static -> fully unrolled
        lg = logits[:, g * V:(g + 1) * V]                         # (TM, V)
        mx = jnp.max(lg, axis=-1, keepdims=True)
        iota = lax.broadcasted_iota(jnp.int32, (TM, V), 1)
        # first index achieving the max (matches torch.max / scatter semantics)
        # note: a NaN logits row would yield an all-zero one-hot (documented).
        kg = jnp.min(jnp.where(lg == mx, iota, V), axis=-1, keepdims=True)
        oh_parts.append((iota == kg).astype(jnp.float32))         # (TM, V) one-hot
        ex = jnp.exp(lg - mx)
        sm_parts.append(ex / jnp.sum(ex, axis=-1, keepdims=True)) # per-group softmax

    onehot = jnp.concatenate(oh_parts, axis=-1)                   # (TM, GV)
    sm = jnp.concatenate(sm_parts, axis=-1)                       # (TM, GV)

    oh_ref[...] = onehot.astype(oh_ref.dtype)
    # single fused MXU matmul against the block-diagonal codebook
    q_ref[...] = jnp.dot(onehot, bd_ref[...],
                         preferred_element_type=jnp.float32).astype(q_ref.dtype)

    # per-tile partial sums (masked so padded rows don't contribute)
    hard_sums = jnp.sum(onehot * valid, axis=0, keepdims=True)    # (1, GV)
    soft_sums = jnp.sum(sm * valid, axis=0, keepdims=True)        # (1, GV)
    rid = lax.broadcasted_iota(jnp.int32, (8, GV), 0)
    hard_b = jnp.broadcast_to(hard_sums, (8, GV))
    soft_b = jnp.broadcast_to(soft_sums, (8, GV))
    zeros = jnp.zeros((8, GV), jnp.float32)
    stats_ref[...] = jnp.where(rid == 0, hard_b, jnp.where(rid == 1, soft_b, zeros))


def _block_diag_codebook(codebook):
    """(G*V, VAR_DIM) codebook -> (G*V, VQ_DIM) block-diagonal matrix."""
    bd = jnp.zeros((GROUPS * NUM_VARS, VQ_DIM), dtype=codebook.dtype)
    for g in range(GROUPS):
        bd = bd.at[g * NUM_VARS:(g + 1) * NUM_VARS,
                   g * VAR_DIM:(g + 1) * VAR_DIM].set(
                       codebook[g * NUM_VARS:(g + 1) * NUM_VARS])
    return bd


def gumbel_vq_forward(x, W, b, codebook, *, tm=4096, produce_targets=True):
    """x: (B, T, C) float32 (time_first=True layout). Returns dict like the torch module."""
    B, T, C = x.shape
    assert C == DIM
    assert not COMBINE_GROUPS
    BT = B * T
    GV = GROUPS * NUM_VARS

    # pick the largest tile that isn't bigger than the (8-aligned) problem; pad rows.
    tm_eff = max(8, _round_up(min(tm, _round_up(BT, 8)), 8))
    n_tiles = -(-BT // tm_eff)
    BT_pad = n_tiles * tm_eff

    xf = x.reshape(BT, C)
    if BT_pad != BT:
        xf = jnp.pad(xf, ((0, BT_pad - BT), (0, 0)))
    b2 = b.reshape(1, GV)
    bd = _block_diag_codebook(codebook)

    out_shapes = (
        jax.ShapeDtypeStruct((BT_pad, VQ_DIM), jnp.float32),      # quantized x
        jax.ShapeDtypeStruct((BT_pad, GV), jnp.float32),          # hard one-hot (subword_prob)
        jax.ShapeDtypeStruct((n_tiles * 8, GV), jnp.float32),     # per-tile (hard, soft) partials
    )

    kernel = functools.partial(gvq_kernel, valid_rows=BT)

    q, onehot, stats = pl.pallas_call(
        kernel,
        out_shape=out_shapes,
        grid_spec=pltpu.PrefetchScalarGridSpec(
            num_scalar_prefetch=0,
            grid=(n_tiles,),
            in_specs=[
                pl.BlockSpec((tm_eff, C), lambda i: (i, 0)),      # x tile
                pl.BlockSpec((C, GV), lambda i: (0, 0)),          # weight_proj W
                pl.BlockSpec((1, GV), lambda i: (0, 0)),          # weight_proj bias
                pl.BlockSpec((GV, VQ_DIM), lambda i: (0, 0)),     # block-diag codebook
            ],
            out_specs=[
                pl.BlockSpec((tm_eff, VQ_DIM), lambda i: (i, 0)),
                pl.BlockSpec((tm_eff, GV), lambda i: (i, 0)),
                pl.BlockSpec((8, GV), lambda i: (i, 0)),          # per-tile partial sums
            ],
        ),
        # no cross-step state -> safe to shard the grid axis across TensorCores (v7x).
        # VMEM footprint at tm=4096 is ~2.5 MiB total, far below the scoped default
        # on v5e/v6e/v7x, so vmem_limit_bytes is left unset.
        compiler_params=pltpu.CompilerParams(
            dimension_semantics=("parallel",)),
    )(xf, W, b2, bd)

    # ---- small epilogue (plain JAX glue) ----
    stats = stats.reshape(n_tiles, 8, GV)
    hard_sum = jnp.sum(stats[:, 0, :], axis=0)                    # (GV,)
    soft_sum = jnp.sum(stats[:, 1, :], axis=0)                    # (GV,)
    hard_probs = (hard_sum / BT).reshape(GROUPS, NUM_VARS)
    avg_probs = (soft_sum / BT).reshape(GROUPS, NUM_VARS)
    code_ppl = jnp.sum(jnp.exp(-jnp.sum(hard_probs * jnp.log(hard_probs + 1e-7), axis=-1)))
    prob_ppl = jnp.sum(jnp.exp(-jnp.sum(avg_probs * jnp.log(avg_probs + 1e-7), axis=-1)))
    num_vars_total = NUM_VARS * GROUPS

    q = q[:BT]
    onehot = onehot[:BT]

    result = {
        'num_vars': num_vars_total,
        'code_perplexity': code_ppl,
        'prob_perplexity': prob_ppl,
        'temp': TEMP[0],
        'subword_prob': onehot.reshape(B, T, GV),
        'loss': (num_vars_total - prob_ppl) / num_vars_total,
        'x': q.reshape(B, T, VQ_DIM),
    }
    if produce_targets:
        # first-argmax over the one-hot == index of the (first) max logit per group
        tgt = jnp.argmax(onehot.reshape(BT, GROUPS, NUM_VARS), axis=-1)
        result['targets'] = tgt.reshape(B, T, GROUPS).astype(jnp.int32)
    return result


if __name__ == "__main__":
    key = jax.random.PRNGKey(0)
    kx, kw, kv = jax.random.split(key, 3)

    B, T = 2, 8
    x = jax.random.normal(kx, (B, T, DIM), dtype=jnp.float32)

    # deterministic parameter init, matching the module's init scheme:
    #   weight_proj: normal(0, 1) weight, zero bias; vars: uniform(0, 1)
    W = jax.random.normal(kw, (DIM, GROUPS * NUM_VARS), dtype=jnp.float32)
    b = jnp.zeros((GROUPS * NUM_VARS,), dtype=jnp.float32)
    codebook = jax.random.uniform(kv, (GROUPS * NUM_VARS, VAR_DIM), dtype=jnp.float32)

    out = gumbel_vq_forward(x, W, b, codebook)
    jax.block_until_ready(out['x'])
    jax.block_until_ready(out['loss'])
    jax.block_until_ready(out['code_perplexity'])

    assert out['x'].shape == (B, T, VQ_DIM)
    assert out['subword_prob'].shape == (B, T, GROUPS * NUM_VARS)
    assert out['targets'].shape == (B, T, GROUPS)
    assert bool(jnp.isfinite(out['loss']))
    print("KERNEL_OK")
</pallas_src>

<mosaic_0001>
module attributes {stable_mosaic.version = 11 : i64} {
  func.func @gvq_kernel(%arg0: i32, %arg1: memref<16x32xf32, #tpu.memory_space<vmem>>, %arg2: memref<32x16xf32, #tpu.memory_space<vmem>>, %arg3: memref<1x16xf32, #tpu.memory_space<vmem>>, %arg4: memref<16x32xf32, #tpu.memory_space<vmem>>, %arg5: memref<16x32xf32, #tpu.memory_space<vmem>>, %arg6: memref<16x16xf32, #tpu.memory_space<vmem>>, %arg7: memref<8x16xf32, #tpu.memory_space<vmem>>) attributes {dimension_semantics = [#tpu.dimension_semantics<parallel>], iteration_bounds = array<i64: 1>, scalar_prefetch = 0 : i64, scratch_operands = 0 : i64, tpu.core_type = #tpu.core_type<tc>, window_params = [{transform_indices = @transform_0, window_bounds = array<i64: 16, 32>}, {pipeline_mode = #tpu.pipeline_mode<synchronous>, transform_indices = @transform_1, window_bounds = array<i64: 32, 16>}, {pipeline_mode = #tpu.pipeline_mode<synchronous>, transform_indices = @transform_2, window_bounds = array<i64: 1, 16>}, {pipeline_mode = #tpu.pipeline_mode<synchronous>, transform_indices = @transform_3, window_bounds = array<i64: 16, 32>}, {transform_indices = @transform_4, window_bounds = array<i64: 16, 32>}, {transform_indices = @transform_5, window_bounds = array<i64: 16, 16>}, {transform_indices = @transform_6, window_bounds = array<i64: 8, 16>}]} {
    %c0 = arith.constant 0 : index
    %c0_0 = arith.constant 0 : index
    %0 = vector.load %arg1[%c0, %c0_0] : memref<16x32xf32, #tpu.memory_space<vmem>>, vector<16x32xf32>
    %c0_1 = arith.constant 0 : index
    %c0_2 = arith.constant 0 : index
    %1 = vector.load %arg2[%c0_1, %c0_2] : memref<32x16xf32, #tpu.memory_space<vmem>>, vector<32x16xf32>
    %cst = arith.constant dense<0.000000e+00> : vector<16x16xf32>
    %2 = tpu.matmul %0, %1, %cst {dimension_numbers = #tpu.dot_dimension_numbers<[1], [0], [0], [1], [0, 0, 1, 1], [], []>} : vector<16x32xf32>, vector<32x16xf32>, vector<16x16xf32> -> vector<16x16xf32>
    %c0_3 = arith.constant 0 : index
    %c0_4 = arith.constant 0 : index
    %3 = vector.load %arg3[%c0_3, %c0_4] : memref<1x16xf32, #tpu.memory_space<vmem>>, vector<1x16xf32>
    %4 = vector.broadcast %3 : vector<1x16xf32> to vector<16x16xf32>
    %5 = arith.addf %2, %4 : vector<16x16xf32>
    %c16_i32 = arith.constant 16 : i32
    %6 = arith.muli %arg0, %c16_i32 : i32
    %7 = tpu.iota {dimensions = array<i32: 0>} : vector<16x1xi32>
    %8 = vector.broadcast %6 : i32 to vector<16x1xi32>
    %9 = arith.addi %8, %7 : vector<16x1xi32>
    %c16_i32_5 = arith.constant 16 : i32
    %10 = vector.broadcast %c16_i32_5 : i32 to vector<16x1xi32>
    %11 = arith.cmpi slt, %9, %10 : vector<16x1xi32>
    %12 = arith.extui %11 : vector<16x1xi1> to vector<16x1xi32>
    %13 = arith.sitofp %12 : vector<16x1xi32> to vector<16x1xf32>
    %14 = vector.extract_strided_slice %5 {offsets = [0, 0], sizes = [16, 8], strides = [1, 1]} : vector<16x16xf32> to vector<16x8xf32>
    %cst_6 = arith.constant dense<0xFF800000> : vector<16xf32>
    %15 = vector.multi_reduction <maximumf>, %14, %cst_6 [1] : vector<16x8xf32> to vector<16xf32>
    %16 = vector.shape_cast %15 : vector<16xf32> to vector<16x1xf32>
    %17 = tpu.iota {dimensions = array<i32: 1>} : vector<16x8xi32>
    %18 = vector.broadcast %16 : vector<16x1xf32> to vector<16x8xf32>
    %19 = arith.cmpf oeq, %14, %18 : vector<16x8xf32>
    %c8_i32 = arith.constant 8 : i32
    %20 = vector.broadcast %c8_i32 : i32 to vector<16x8xi32>
    %21 = arith.select %19, %17, %20 : vector<16x8xi1>, vector<16x8xi32>
    %cst_7 = arith.constant dense<2147483647> : vector<16xi32>
    %22 = vector.multi_reduction <minsi>, %21, %cst_7 [1] : vector<16x8xi32> to vector<16xi32>
    %23 = vector.shape_cast %22 : vector<16xi32> to vector<16x1xi32>
    %24 = vector.broadcast %23 : vector<16x1xi32> to vector<16x8xi32>
    %25 = arith.cmpi eq, %17, %24 : vector<16x8xi32>
    %26 = arith.extui %25 : vector<16x8xi1> to vector<16x8xi32>
    %27 = arith.sitofp %26 : vector<16x8xi32> to vector<16x8xf32>
    %28 = vector.broadcast %16 : vector<16x1xf32> to vector<16x8xf32>
    %29 = arith.subf %14, %28 : vector<16x8xf32>
    %30 = math.exp %29 : vector<16x8xf32>
    %cst_8 = arith.constant dense<0.000000e+00> : vector<16xf32>
    %31 = vector.multi_reduction <add>, %30, %cst_8 [1] : vector<16x8xf32> to vector<16xf32>
    %32 = vector.shape_cast %31 : vector<16xf32> to vector<16x1xf32>
    %33 = vector.broadcast %32 : vector<16x1xf32> to vector<16x8xf32>
    %34 = arith.divf %30, %33 : vector<16x8xf32>
    %35 = vector.extract_strided_slice %5 {offsets = [0, 8], sizes = [16, 8], strides = [1, 1]} : vector<16x16xf32> to vector<16x8xf32>
    %cst_9 = arith.constant dense<0xFF800000> : vector<16xf32>
    %36 = vector.multi_reduction <maximumf>, %35, %cst_9 [1] : vector<16x8xf32> to vector<16xf32>
    %37 = vector.shape_cast %36 : vector<16xf32> to vector<16x1xf32>
    %38 = tpu.iota {dimensions = array<i32: 1>} : vector<16x8xi32>
    %39 = vector.broadcast %37 : vector<16x1xf32> to vector<16x8xf32>
    %40 = arith.cmpf oeq, %35, %39 : vector<16x8xf32>
    %c8_i32_10 = arith.constant 8 : i32
    %41 = vector.broadcast %c8_i32_10 : i32 to vector<16x8xi32>
    %42 = arith.select %40, %38, %41 : vector<16x8xi1>, vector<16x8xi32>
    %cst_11 = arith.constant dense<2147483647> : vector<16xi32>
    %43 = vector.multi_reduction <minsi>, %42, %cst_11 [1] : vector<16x8xi32> to vector<16xi32>
    %44 = vector.shape_cast %43 : vector<16xi32> to vector<16x1xi32>
    %45 = vector.broadcast %44 : vector<16x1xi32> to vector<16x8xi32>
    %46 = arith.cmpi eq, %38, %45 : vector<16x8xi32>
    %47 = arith.extui %46 : vector<16x8xi1> to vector<16x8xi32>
    %48 = arith.sitofp %47 : vector<16x8xi32> to vector<16x8xf32>
    %49 = vector.broadcast %37 : vector<16x1xf32> to vector<16x8xf32>
    %50 = arith.subf %35, %49 : vector<16x8xf32>
    %51 = math.exp %50 : vector<16x8xf32>
    %cst_12 = arith.constant dense<0.000000e+00> : vector<16xf32>
    %52 = vector.multi_reduction <add>, %51, %cst_12 [1] : vector<16x8xf32> to vector<16xf32>
    %53 = vector.shape_cast %52 : vector<16xf32> to vector<16x1xf32>
    %54 = vector.broadcast %53 : vector<16x1xf32> to vector<16x8xf32>
    %55 = arith.divf %51, %54 : vector<16x8xf32>
    %56 = tpu.concatenate %27, %48 in 1 : vector<16x8xf32>, vector<16x8xf32> -> vector<16x16xf32>
    %57 = tpu.concatenate %34, %55 in 1 : vector<16x8xf32>, vector<16x8xf32> -> vector<16x16xf32>
    %c0_13 = arith.constant 0 : index
    %c0_14 = arith.constant 0 : index
    %58 = vector.load %arg6[%c0_13, %c0_14] : memref<16x16xf32, #tpu.memory_space<vmem>>, vector<16x16xf32>
    tpu.vector_store %arg6[%c0_13, %c0_14], %56 {strides = array<i32>} : memref<16x16xf32, #tpu.memory_space<vmem>>, vector<16x16xf32>,
    %c0_15 = arith.constant 0 : index
    %c0_16 = arith.constant 0 : index
    %59 = vector.load %arg4[%c0_15, %c0_16] : memref<16x32xf32, #tpu.memory_space<vmem>>, vector<16x32xf32>
    %cst_17 = arith.constant dense<0.000000e+00> : vector<16x32xf32>
    %60 = tpu.matmul %56, %59, %cst_17 {dimension_numbers = #tpu.dot_dimension_numbers<[1], [0], [0], [1], [0, 0, 1, 1], [], []>} : vector<16x16xf32>, vector<16x32xf32>, vector<16x32xf32> -> vector<16x32xf32>
    %c0_18 = arith.constant 0 : index
    %c0_19 = arith.constant 0 : index
    %61 = vector.load %arg5[%c0_18, %c0_19] : memref<16x32xf32, #tpu.memory_space<vmem>>, vector<16x32xf32>
    tpu.vector_store %arg5[%c0_18, %c0_19], %60 {strides = array<i32>} : memref<16x32xf32, #tpu.memory_space<vmem>>, vector<16x32xf32>,
    %62 = vector.broadcast %13 : vector<16x1xf32> to vector<16x16xf32>
    %63 = arith.mulf %56, %62 : vector<16x16xf32>
    %cst_20 = arith.constant dense<0.000000e+00> : vector<16xf32>
    %64 = vector.multi_reduction <add>, %63, %cst_20 [0] : vector<16x16xf32> to vector<16xf32>
    %65 = vector.shape_cast %64 : vector<16xf32> to vector<1x16xf32>
    %66 = vector.broadcast %13 : vector<16x1xf32> to vector<16x16xf32>
    %67 = arith.mulf %57, %66 : vector<16x16xf32>
    %cst_21 = arith.constant dense<0.000000e+00> : vector<16xf32>
    %68 = vector.multi_reduction <add>, %67, %cst_21 [0] : vector<16x16xf32> to vector<16xf32>
    %69 = vector.shape_cast %68 : vector<16xf32> to vector<1x16xf32>
    %70 = tpu.iota {dimensions = array<i32: 0>} : vector<8x16xi32>
    %71 = vector.shape_cast %65 : vector<1x16xf32> to vector<1x16xf32>
    %72 = vector.broadcast %71 : vector<1x16xf32> to vector<8x16xf32>
    %73 = vector.shape_cast %69 : vector<1x16xf32> to vector<1x16xf32>
    %74 = vector.broadcast %73 : vector<1x16xf32> to vector<8x16xf32>
    %cst_22 = arith.constant 0.000000e+00 : f32
    %75 = vector.broadcast %cst_22 : f32 to vector<8x16xf32>
    %c0_i32 = arith.constant 0 : i32
    %76 = vector.broadcast %c0_i32 : i32 to vector<8x16xi32>
    %77 = arith.cmpi eq, %70, %76 : vector<8x16xi32>
    %c1_i32 = arith.constant 1 : i32
    %78 = vector.broadcast %c1_i32 : i32 to vector<8x16xi32>
    %79 = arith.cmpi eq, %70, %78 : vector<8x16xi32>
    %80 = arith.select %79, %74, %75 : vector<8x16xi1>, vector<8x16xf32>
    %81 = arith.select %77, %72, %80 : vector<8x16xi1>, vector<8x16xf32>
    %c0_23 = arith.constant 0 : index
    %c0_24 = arith.constant 0 : index
    %82 = vector.load %arg7[%c0_23, %c0_24] : memref<8x16xf32, #tpu.memory_space<vmem>>, vector<8x16xf32>
    tpu.vector_store %arg7[%c0_23, %c0_24], %81 {strides = array<i32>} : memref<8x16xf32, #tpu.memory_space<vmem>>, vector<8x16xf32>,
    return
  }
  func.func @transform_0(%arg0: i32) -> (i32, i32) {
    %c0_i32 = arith.constant 0 : i32
    %c0_i32_0 = arith.constant 0 : i32
    return %arg0, %c0_i32 : i32, i32
  }
  func.func @transform_1(%arg0: i32) -> (i32, i32) {
    %c0_i32 = arith.constant 0 : i32
    %c0_i32_0 = arith.constant 0 : i32
    %c0_i32_1 = arith.constant 0 : i32
    return %c0_i32, %c0_i32_0 : i32, i32
  }
  func.func @transform_2(%arg0: i32) -> (i32, i32) {
    %c0_i32 = arith.constant 0 : i32
    %c0_i32_0 = arith.constant 0 : i32
    %c0_i32_1 = arith.constant 0 : i32
    return %c0_i32, %c0_i32_0 : i32, i32
  }
  func.func @transform_3(%arg0: i32) -> (i32, i32) {
    %c0_i32 = arith.constant 0 : i32
    %c0_i32_0 = arith.constant 0 : i32
    %c0_i32_1 = arith.constant 0 : i32
    return %c0_i32, %c0_i32_0 : i32, i32
  }
  func.func @transform_4(%arg0: i32) -> (i32, i32) {
    %c0_i32 = arith.constant 0 : i32
    %c0_i32_0 = arith.constant 0 : i32
    return %arg0, %c0_i32 : i32, i32
  }
  func.func @transform_5(%arg0: i32) -> (i32, i32) {
    %c0_i32 = arith.constant 0 : i32
    %c0_i32_0 = arith.constant 0 : i32
    return %arg0, %c0_i32 : i32, i32
  }
  func.func @transform_6(%arg0: i32) -> (i32, i32) {
    %c0_i32 = arith.constant 0 : i32
    %c0_i32_0 = arith.constant 0 : i32
    return %arg0, %c0_i32 : i32, i32
  }
}

</mosaic_0001>

<bundles_post_ra>
// kernel: tpu_custom_call.1
= control target key start
LH: loop header
LB: loop body
LE: loop exit
PB: predicated region body
PF: predicated region fallthrough
CT: control target
= control target key end

     0   :  { %12 = vsyncpa [#allocation3], 0  ;;  %vm35_vm0 = vcmask 261120   ;;  %v118_v3 = vlaneseq  ;;  %s774_s0 = inlined_call_operand.vmem [shape: f32[16,32], index: 0, kind: input, shape index: {}]   ;;  %s775_s1 = inlined_call_operand.vmem [shape: f32[32,16], index: 1, kind: input, shape index: {}]   ;;  %s776_s2 = inlined_call_operand.vmem [shape: f32[1,16], index: 2, kind: input, shape index: {}]   ;;  %s777_s3 = inlined_call_operand.vmem [shape: f32[16,32], index: 3, kind: input, shape index: {}]   ;;  %s778_s4 = inlined_call_operand.hbm [shape: f32[16,32], index: 4, kind: output, shape index: {0}]   ;;  %s779_s5 = inlined_call_operand.hbm [shape: f32[16,16], index: 5, kind: output, shape index: {1}]   ;;  %s780_s6 = inlined_call_operand.hbm [shape: f32[8,16], index: 6, kind: output, shape index: {2}]  }
   0x1   :  { %v24_v0 = vld [vmem:[%s775_s1] sm:$0xff]  ;;  %v25_v1 = vld [vmem:[%s775_s1 + $0x8] sm:$0xff]  ;;  %v26_v2 = vld [vmem:[%s775_s1 + $0x10] sm:$0xff] }
   0x2   :  { %v477_v4 = vpack.c.bf16 %v25_v1, %v24_v0  ;;  %v27_v5 = vld [vmem:[%s775_s1 + $0x18] sm:$0xff]  ;;  %v22_v6 = vld [vmem:[%s774_s0] sm:$0xff]  ;;  %v646_v8 = vand.u32 127, %v118_v3 }
   0x3   :  { %v481_v7 = vpack.c.bf16 %v27_v5, %v26_v2  ;;  %467 = vmatprep.mubr.msk.f32.mxu0 %vm35_vm0, %v22_v6 }
   0x4   :  { %13 = vsyncpa [#allocation5], 0  ;;  %478 = vmatprep.subr.bf16.mxu0 %v477_v4  ;;  %s587_s7 = smov 8   ;;  %v23_v9 = vld [vmem:[%s774_s0 + $0x8] sm:$0xff]  ;;  %v440_v10 = vld [vmem:[%s776_s2] ss:$0 sm:$0xff] }
   0x5   :  { %480 = vmatpush3.bf16.msra.mxu0 %v477_v4  ;;  %204 = vrot.lane.b32.xlu1 %v646_v8, %s587_s7  ;;  %vm195_vm1 = vcmask 130112   ;;  %vm130_vm2 = vcmask 64512   ;;  %s588_s0 = smov 120   ;;  %v283_v2 = vld [vmem:[%s777_s3] sm:$0xff]  ;;  %v284_v4 = vld [vmem:[%s777_s3 + $0x8] sm:$0xff]  ;;  %vm280_vm15 = vcmask 130048  }
   0x6   :  { %482 = vmatprep.subr.bf16.mxu0 %v481_v7  ;;  %s590_s3 = smov [#allocation4]  }
   0x7   :  { %s412_s14 = sshll.u32 %s590_s3, 4  ;;  %s413_s14 = int_to_ptr.vmem [resolvable:$true] %s412_s14 }
   0x8   :  { %s517_s15 = scalar_lea.vmem %s413_s14, 256  ;;  %p522_p1 = scmp.lt.s32.totalorder %s413_s14, %s413_s14 }
   0x9   :  { %484 = vmatpush3.bf16.msra.mxu0 %v481_v7  ;;  %p518_p0 = scmp.ne.s32.totalorder %s413_s14, %s517_s15  ;;  %p523_p2 = scmp.lt.s32.totalorder %s517_s15, %s517_s15 }
   0xb   :  { %p524_p3 = por %p523_p2, %p522_p1 }
   0xc   :  { %468 = vmatmul.mubr.msk.f32.vlgmr.msra.gmra.mrb[0].mxu0 %vm35_vm0, %v23_v9  ;;  %v485_v9 = vpack.c.bf16 %v284_v4, %v283_v2 }
   0xd   :  { %p525_p4 = pnand %p524_p3, %p518_p0 }
   0xe   :  { %486 = vmatprep.subr.bf16.mxu1 %v485_v9 }
   0xf   :  { %488 = vmatpush3.bf16.msra.mxu1 %v485_v9 }
  0x77   :  { %v205_v19 = vpop.permute.xlu1 %204 }
  0xdf   :  { %v469_v11 = vpop.f32.mrb[0].mxu0 }
  0xe0   :  { %v108_v12 = vpop.f32.mrb[1].mxu0  ;;  %v659_v14 = vadd.f32 %v469_v11, %v440_v10 }
  0xe1   :  { %v657_v13 = vadd.f32 %v440_v10, %v108_v12 }
  0xe2   :  { %v199_v17 = vsel %vm195_vm1, %v659_v14, -inf  ;;  %v134_v18 = vsel %vm130_vm2, %v659_v14, -inf }
  0xe3   :  { %v196_v15 = vsel %vm195_vm1, %v657_v13, -inf  ;;  %v131_v16 = vsel %vm130_vm2, %v657_v13, -inf }
  0xe4   :  { %197 = vmax.xlane.f32.xlu0 %v196_v15  ;;  %132 = vmax.xlane.f32.xlu1 %v131_v16 }
  0xe8   :  { %200 = vmax.xlane.f32.xlu0 %v199_v17 }
  0xec   :  { %135 = vmax.xlane.f32.xlu0 %v134_v18 }
 0x171   :  { %v198_v20 = vpop.xlane.xlu0 %197  ;;  %v669_v21 = vpop.xlane.xlu1 %132 }
 0x172   :  { %vm202_vm3 = vcmp.eq.f32.partialorder %v657_v13, %v198_v20  ;;  %vm139_vm4 = vcmp.eq.f32.partialorder %v657_v13, %v669_v21  ;;  %v244_v56 = vsub.f32 %v657_v13, %v198_v20 }
 0x173   :  { %v206_v22 = vsel %vm202_vm3, %v205_v19, 8  ;;  %v141_v24 = vsel %vm139_vm4, %v646_v8, 8 }
 0x174   :  { %v208_v23 = vsel %vm195_vm1, %v206_v22, 2147483647  ;;  %v143_v30 = vsel %vm130_vm2, %v141_v24, 2147483647  ;;  %v246_v57 = vmul.f32 1.442695, %v244_v56 }
 0x175   :  { %v676_v25 = vpop.xlane.xlu0 %200  ;;  %v210_v26 = vshra.s32 %v208_v23, 16  ;;  %v145_v35 = vshra.s32 %v143_v30, 16  ;;  %v209_v40 = vand.u32 65535, %v208_v23  ;;  %v144_v47 = vand.u32 65535, %v143_v30 }
 0x176   :  { %vm203_vm5 = vcmp.eq.f32.partialorder %v659_v14, %v676_v25  ;;  %501 = vpow2.f32 %v246_v57  ;;  %v245_v0 = vsub.f32 %v659_v14, %v676_v25  ;;  %v589_v23 = vmov 0.0  }
 0x177   :  { %v207_v27 = vsel %vm203_vm5, %v205_v19, 8  ;;  %v212_v28 = vcvt.s32.f32 %v210_v26  ;;  %v147_v37 = vcvt.s32.f32 %v145_v35  ;;  %v211_v42 = vcvt.s32.f32 %v209_v40 }
 0x178   :  { %v223_v29 = vsel %vm195_vm1, %v207_v27, 2147483647  ;;  %v146_v50 = vcvt.s32.f32 %v144_v47  ;;  %v248_v10 = vmul.f32 1.442695, %v245_v0 }
 0x179   :  { %213 = vmin.xlane.f32.xlu0 %v212_v28  ;;  %v136_v31 = vpop.xlane.xlu0 %135  ;;  %v225_v32 = vshra.s32 %v223_v29, 16  ;;  %v224_v43 = vand.u32 65535, %v223_v29 }
 0x17a   :  { %vm140_vm6 = vcmp.eq.f32.partialorder %v659_v14, %v136_v31  ;;  %v180_v59 = vsub.f32 %v659_v14, %v136_v31 }
 0x17b   :  { %v142_v33 = vsel %vm140_vm6, %v646_v8, 8  ;;  %v227_v34 = vcvt.s32.f32 %v225_v32  ;;  %v226_v46 = vcvt.s32.f32 %v224_v43 }
 0x17c   :  { %v158_v36 = vsel %vm130_vm2, %v142_v33, 2147483647  ;;  %v183_v60 = vmul.f32 1.442695, %v180_v59 }
 0x17d   :  { %228 = vmin.xlane.f32.xlu0 %v227_v34  ;;  %v160_v38 = vshra.s32 %v158_v36, 16  ;;  %v159_v51 = vand.u32 65535, %v158_v36 }
 0x17e   :  { %503 = vpow2.f32 %v183_v60 }
 0x17f   :  { %v162_v39 = vcvt.s32.f32 %v160_v38  ;;  %v161_v54 = vcvt.s32.f32 %v159_v51  ;;  %505 = vpow2.f32 %v248_v10 }
 0x180   :  { %v686_v58 = vpop.eup %501 }
 0x181   :  { %148 = vmin.xlane.f32.xlu0 %v147_v37 }
 0x185   :  { %163 = vmin.xlane.f32.xlu0 %v162_v39 }
 0x188   :  { %v691_v61 = vpop.eup %503 }
 0x189   :  { %v188_v62 = vsel %vm130_vm2, %v691_v61, 0.0  ;;  %v506_v33 = vpop.eup %505 }
 0x206   :  { %v214_v41 = vpop.xlane.xlu0 %213 }
 0x207   :  { %vm215_vm7 = vcmp.eq.f32.partialorder %v212_v28, %v214_v41  ;;  %v220_v63 = vcvt.f32.s32 %v214_v41 }
 0x208   :  { %v216_v44 = vsel %vm215_vm7, %v211_v42, inf }
 0x209   :  { %217 = vmin.xlane.f32.xlu0 %v216_v44  ;;  %v221_v5 = vshll.u32 %v220_v63, 16 }
 0x20a   :  { %v229_v45 = vpop.xlane.xlu0 %228 }
 0x20b   :  { %vm230_vm8 = vcmp.eq.f32.partialorder %v227_v34, %v229_v45  ;;  %v235_v6 = vcvt.f32.s32 %v229_v45 }
 0x20c   :  { %v231_v48 = vsel %vm230_vm8, %v226_v46, inf }
 0x20d   :  { %232 = vmin.xlane.f32.xlu0 %v231_v48  ;;  %v236_v15 = vshll.u32 %v235_v6, 16 }
 0x20e   :  { %v149_v49 = vpop.xlane.xlu0 %148 }
 0x20f   :  { %vm150_vm9 = vcmp.eq.f32.partialorder %v147_v37, %v149_v49  ;;  %v155_v14 = vcvt.f32.s32 %v149_v49  ;;  %v179_v37 = vsub.f32 %v657_v13, %v669_v21 }
 0x210   :  { %v151_v52 = vsel %vm150_vm9, %v146_v50, inf }
 0x211   :  { %152 = vmin.xlane.f32.xlu0 %v151_v52  ;;  %v156_v19 = vshll.u32 %v155_v14, 16  ;;  %v181_v38 = vmul.f32 1.442695, %v179_v37 }
 0x212   :  { %v164_v53 = vpop.xlane.xlu0 %163 }
 0x213   :  { %vm165_vm10 = vcmp.eq.f32.partialorder %v162_v39, %v164_v53  ;;  %v170_v20 = vcvt.f32.s32 %v164_v53  ;;  %507 = vpow2.f32 %v181_v38 }
 0x214   :  { %v166_v55 = vsel %vm165_vm10, %v161_v54, inf }
 0x215   :  { %167 = vmin.xlane.f32.xlu0 %v166_v55  ;;  %v171_v29 = vshll.u32 %v170_v20, 16 }
 0x21d   :  { %v508_v39 = vpop.eup %507 }
 0x21e   :  { %v185_v40 = vsel %vm130_vm2, %v508_v39, 0.0 }
 0x22b   :  { %252 = vrot.lane.b32.xlu0 %v686_v58, %s588_s0 }
 0x24a   :  { %189 = vadd.xlane.f32.xlu0 %v188_v62 }
 0x296   :  { %v218_v1 = vpop.xlane.xlu0 %217 }
 0x297   :  { %v219_v7 = vcvt.f32.s32 %v218_v1 }
 0x299   :  { %v222_v11 = vadd.s32 %v221_v5, %v219_v7 }
 0x29a   :  { %v233_v12 = vpop.xlane.xlu0 %232 }
 0x29b   :  { %v234_v16 = vcvt.f32.s32 %v233_v12  ;;  %vm238_vm11 = vcmp.eq.s32.totalorder %v646_v8, %v222_v11 }
 0x29c   :  { %v445_v24 = vsel %vm238_vm11, 1.0, %v589_v23 }
 0x29d   :  { %v237_v17 = vadd.s32 %v236_v15, %v234_v16 }
 0x29e   :  { %v153_v18 = vpop.xlane.xlu0 %152 }
 0x29f   :  { %vm239_vm12 = vcmp.eq.s32.totalorder %v646_v8, %v237_v17  ;;  %v154_v22 = vcvt.f32.s32 %v153_v18 }
 0x2a0   :  { %v446_v25 = vsel %vm239_vm12, 1.0, %v589_v23 }
 0x2a1   :  { %v157_v26 = vadd.s32 %v156_v19, %v154_v22  ;;  %v496_v27 = vpack.i.bf16 %v446_v25, %v445_v24 }
 0x2a2   :  { %v168_v28 = vpop.xlane.xlu0 %167 }
 0x2a3   :  { %vm173_vm13 = vcmp.eq.s32.totalorder %v646_v8, %v157_v26  ;;  %v169_v30 = vcvt.f32.s32 %v168_v28  ;;  %497 = vrot.lane.b32.xlu1 %v496_v27, %s587_s7 }
 0x2a4   :  { %v443_v31 = vsel %vm173_vm13, 1.0, %v589_v23 }
 0x2a5   :  { %v172_v32 = vadd.s32 %v171_v29, %v169_v30 }
 0x2a6   :  { %v253_v34 = vpop.permute.xlu0 %252 }
 0x2a7   :  { %vm174_vm14 = vcmp.eq.s32.totalorder %v646_v8, %v172_v32  ;;  %254 = vrot.lane.b32.xlu1 %v506_v33, %s588_s0  ;;  %v258_v35 = vsel %vm130_vm2, %v253_v34, 0.0 }
 0x2a8   :  { %v444_v36 = vsel %vm174_vm14, 1.0, %v589_v23  ;;  %259 = vadd.xlane.f32.xlu0 %v258_v35 }
 0x2cb   :  { %186 = vadd.xlane.f32.xlu1 %v185_v40 }
 0x315   :  { %v498_v41 = vpop.permute.xlu1 %497 }
 0x316   :  { %v500_v42 = vunpack.i.h.bf16 %v498_v41  ;;  %v499_v43 = vunpack.i.l.bf16 %v498_v41 }
 0x318   :  { %v276_v8 = vsel %vm130_vm2, %v443_v31, %v499_v43  ;;  %v277_v44 = vsel %vm130_vm2, %v444_v36, %v500_v42 }
 0x319   :  { %v255_v45 = vpop.permute.xlu1 %254  ;;  %281 = vst.msk [vmem:[#allocation4] sm:$0xff] %vm280_vm15, %v276_v8  ;;  %474 = vmatprep.mubr.msk.f32.mxu1 %vm280_vm15, %v276_v8  ;;  %v370_v13 = vsel %vm280_vm15, %v276_v8, 0.0  ;;  %282 = vst.msk [vmem:[#allocation4 + $0x8] sm:$0xff] %vm280_vm15, %v277_v44  ;;  %v371_v21 = vsel %vm280_vm15, %v277_v44, 0.0 }
 0x31a   :  { %475 = vmatmul.mubr.msk.f32.vlgmr.msra.gmra.mrb[0].mxu1 %vm280_vm15, %v277_v44  ;;  %v372_v46 = vadd.f32 %v371_v21, %v370_v13  ;;  %v261_v47 = vsel %vm130_vm2, %v255_v45, 0.0 }
 0x31b   :  { %262 = vadd.xlane.f32.xlu1 %v261_v47 }
 0x31c   :  { %528 = shalt.err (!%p525_p4)
}
 0x31d   :  { %s529_s18 = scalar_lea.hbm %s779_s5, 256 }
 0x31e   :  { %p530_p5 = scmp.ne.s32.totalorder %s779_s5, %s529_s18  ;;  %p533_p6 = scmp.lt.u32.totalorder %s529_s18, %s779_s5 }
 0x320   :  { %p535_p7 = pnand %p533_p6, %p530_p5 }
 0x322   :  { %538 = shalt.err (!%p535_p7)
}
 0x323   :  { %s591_s23 = smov 128   ;;  %v190_v48 = vpop.xlane.xlu0 %189  ;;  %v373_v56 = vrot.slane %v372_v46, 4 }
 0x324   :  { %418 = dma.vmem_to_hbm [thread:$0]  %s413_s14, 256, %s779_s5, [#allocation5], %s591_s23, %s591_s23, %s587_s7  }
 0x325   :  { %v374_v0 = vadd.f32 %v373_v56, %v372_v46  ;;  %s592_s5 = smov [#allocation6]  }
 0x326   :  { %s425_s26 = sshll.u32 %s592_s5, 4  ;;  %s426_s26 = int_to_ptr.vmem [resolvable:$true] %s425_s26 }
 0x327   :  { %v375_v6 = vrot.slane %v374_v0, 2  ;;  %s539_s27 = scalar_lea.vmem %s426_s26, 128  ;;  %p544_p9 = scmp.lt.s32.totalorder %s426_s26, %s426_s26 }
 0x328   :  { %p540_p8 = scmp.ne.s32.totalorder %s426_s26, %s539_s27  ;;  %p545_p10 = scmp.lt.s32.totalorder %s539_s27, %s539_s27 }
 0x329   :  { %v376_v10 = vadd.f32 %v375_v6, %v374_v0 }
 0x32a   :  { %p546_p11 = por %p545_p10, %p544_p9 }
 0x32c   :  { %p547_p12 = pnand %p546_p11, %p540_p8 }
 0x335   :  { %v260_v50 = vpop.xlane.xlu0 %259 }
 0x358   :  { %v187_v49 = vpop.xlane.xlu1 %186 }
 0x359   :  { %509 = vrcp.f32 %v187_v49 }
 0x35a   :  { %511 = vrcp.f32 %v260_v50 }
 0x35b   :  { %513 = vrcp.f32 %v190_v48 }
 0x363   :  { %v510_v52 = vpop.eup %509 }
 0x364   :  { %v512_v53 = vpop.eup %511  ;;  %v192_v54 = vmul.f32 %v510_v52, %v508_v39 }
 0x365   :  { %v514_v55 = vpop.eup %513  ;;  %v265_v57 = vmul.f32 %v512_v53, %v686_v58  ;;  %v119_v58 = vshrl.u32 %v118_v3, 7 }
 0x366   :  { %v194_v60 = vmul.f32 %v514_v55, %v691_v61  ;;  %v377_v61 = vrot.slane %v376_v10, 1 }
 0x367   :  { %v278_v63 = vsel %vm130_vm2, %v192_v54, %v265_v57  ;;  %vm391_vm1 = vcmp.eq.s32.totalorder %v119_v58, 1 }
 0x368   :  { %v381_v2 = vsel %vm280_vm15, %v278_v63, 0.0  ;;  %v378_v16 = vadd.f32 %v377_v61, %v376_v10 }
 0x3a8   :  { %v263_v51 = vpop.xlane.xlu1 %262 }
 0x3a9   :  { %515 = vrcp.f32 %v263_v51 }
 0x3b3   :  { %v516_v59 = vpop.eup %515 }
 0x3b4   :  { %v267_v62 = vmul.f32 %v516_v59, %v506_v33 }
 0x3b6   :  { %v279_v1 = vsel %vm130_vm2, %v194_v60, %v267_v62  ;;  %vm390_vm2 = vcmp.eq.s32.totalorder %v119_v58, 0 }
 0x3b7   :  { %v382_v4 = vsel %vm280_vm15, %v279_v1, 0.0 }
 0x3b8   :  { %v383_v5 = vadd.f32 %v382_v4, %v381_v2 }
 0x3ba   :  { %v384_v7 = vrot.slane %v383_v5, 4 }
 0x3bc   :  { %v385_v9 = vadd.f32 %v384_v7, %v383_v5 }
 0x3be   :  { %v386_v11 = vrot.slane %v385_v9, 2 }
 0x3c0   :  { %v387_v12 = vadd.f32 %v386_v11, %v385_v9 }
 0x3c2   :  { %v388_v15 = vrot.slane %v387_v12, 1 }
 0x3c4   :  { %v389_v14 = vadd.f32 %v388_v15, %v387_v12 }
 0x3c6   :  { %v392_v17 = vsel %vm391_vm1, %v389_v14, 0.0 }
 0x3c7   :  { %v393_v18 = vsel %vm390_vm2, %v378_v16, %v392_v17 }
 0x3c8   :  { %394 = vst.msk [vmem:[#allocation6] sm:$0xff] %vm280_vm15, %v393_v18 }
 0x3c9   :  { %550 = shalt.err (!%p547_p12)
}
 0x3ca   :  { %s551_s30 = scalar_lea.hbm %s780_s6, 128 }
 0x3cb   :  { %p552_p13 = scmp.ne.s32.totalorder %s780_s6, %s551_s30  ;;  %p555_p0 = scmp.lt.u32.totalorder %s551_s30, %s780_s6 }
 0x3cd   :  { %p557_p1 = pnand %p555_p0, %p552_p13 }
 0x3cf   :  { %560 = shalt.err (!%p557_p1)
}
 0x3d0   :  { %428 = dma.vmem_to_hbm [thread:$0]  %s426_s26, 128, %s780_s6, [#allocation5]  }
 0x3d1   :  { %s593_s11 = smov [#allocation2]  }
 0x3d2   :  { %s400_s12 = sshll.u32 %s593_s11, 4  ;;  %s401_s12 = int_to_ptr.vmem [resolvable:$true] %s400_s12 }
 0x3d3   :  { %s561_s13 = scalar_lea.vmem %s401_s12, 256  ;;  %p566_p3 = scmp.lt.s32.totalorder %s401_s12, %s401_s12 }
 0x3d4   :  { %p562_p2 = scmp.ne.s32.totalorder %s401_s12, %s561_s13  ;;  %p567_p4 = scmp.lt.s32.totalorder %s561_s13, %s561_s13 }
 0x3d6   :  { %p568_p5 = por %p567_p4, %p566_p3 }
 0x3d8   :  { %p569_p6 = pnand %p568_p5, %p562_p2 }
 0x3ed   :  { %v476_v3 = vpop.f32.mrb[0].mxu1 }
 0x3ee   :  { %367 = vst.msk [vmem:[#allocation2 + $0x8] sm:$0xff] %vm35_vm0, %v476_v3  ;;  %v357_v19 = vpop.f32.mrb[1].mxu1 }
 0x3ef   :  { %366 = vst.msk [vmem:[#allocation2] sm:$0xff] %vm35_vm0, %v357_v19 }
 0x3f0   :  { %572 = shalt.err (!%p569_p6)
}
 0x3f1   :  { %s573_s6 = scalar_lea.hbm %s778_s4, 256 }
 0x3f2   :  { %p574_p7 = scmp.ne.s32.totalorder %s778_s4, %s573_s6  ;;  %p577_p8 = scmp.lt.u32.totalorder %s573_s6, %s778_s4 }
 0x3f4   :  { %p579_p9 = pnand %p577_p8, %p574_p7 }
 0x3f6   :  { %582 = shalt.err (!%p579_p9)
}
 0x3f7   :  { %406 = dma.vmem_to_hbm [thread:$0]  %s401_s12, 256, %s778_s4, [#allocation3], %s591_s23, %s591_s23, %s587_s7  }
 0x3f8   :  { %583 = dma.done.wait [#allocation3], 256  }
 0x3f9   :  { %584 = vsyncadd [#allocation3], 4294967040 }
 0x3fa   :  { %585 = dma.done.wait [#allocation5], 384  }
 0x3fb   :  { %586 = vsyncadd [#allocation5], 4294966912 }
 0x3fc   :  { %438 = vsyncpa [#allocation3], 1 }
 0x3fd   :  { %439 = vsyncpa [#allocation5], 1 }

</bundles_post_ra>
